<compile_context>
chip_gen: v6e
topology: v6e:2x2x1
jax: 0.10.0
libtpu: 0.0.40
codegen_flags: <defaults>
</compile_context>

<pallas_src>
import jax
import jax.numpy as jnp
from jax.experimental import pallas as pl
from jax.experimental.pallas import tpu as pltpu


def angle_resnet_block_kernel(a_ref, w1t_ref, b1_ref, w2t_ref, b2_ref, o_ref):
    a = a_ref[...]                                   # (tm, L) packed rows, lane-dense
    h = jnp.maximum(a, 0.0)                          # relu
    h = jnp.dot(h, w1t_ref[...], preferred_element_type=jnp.float32) + b1_ref[...]
    h = jnp.maximum(h, 0.0)                          # relu
    h = jnp.dot(h, w2t_ref[...], preferred_element_type=jnp.float32) + b2_ref[...]
    o_ref[...] = (h + a).astype(o_ref.dtype)         # residual add, unmasked store


def angle_resnet_block(a, w1, b1, w2, b2, *, tile_rows=32768):
    """a: (N, C) float32.  w1, w2: (C, C) in PyTorch (C_out, C_in) layout.  b1, b2: (C,).
    Returns (N, C).  tile_rows is the target row-tile size in ORIGINAL rows."""
    N, C = a.shape
    dtype = a.dtype
    itemsize = jnp.dtype(dtype).itemsize

    # Pack `pack` consecutive C-channel rows onto the 128-lane axis (free reshape,
    # no transpose).  Falls back to pack=1 if C doesn't divide 128.
    pack = 128 // C if (C <= 128 and 128 % C == 0) else 1
    L = C * pack

    # Block-diagonal weights (pre-transposed so the kernel does h @ W_blk_t) and
    # lane-dense bias rows.  These stay resident in VMEM (constant index_map).
    eye = jnp.eye(pack, dtype=dtype)
    w1t_blk = jnp.kron(eye, w1.T)                    # (L, L) == kron(I, W1).T
    w2t_blk = jnp.kron(eye, w2.T)                    # (L, L)
    b1_blk = jnp.tile(b1, pack).reshape(1, L)
    b2_blk = jnp.tile(b2, pack).reshape(1, L)

    # Packed-row tiling: sublane dim must be a multiple of 8; don't over-pad tiny
    # problems; ensure >= 2 grid steps when the problem is big enough (v7x 2 TCs).
    m_min = pl.cdiv(N, pack)                         # packed rows needed
    tm_target = max(8, (tile_rows // pack) // 8 * 8)
    tm = min(tm_target, pl.cdiv(m_min, 8) * 8)
    if m_min >= 16:
        tm = min(tm, pl.cdiv(pl.cdiv(m_min, 2), 8) * 8)
    grid_m = pl.cdiv(m_min, tm)
    m_pad = grid_m * tm
    n_pad = m_pad * pack

    a_in = a
    if n_pad != N:
        a_in = jnp.pad(a, ((0, n_pad - N), (0, 0)))  # pad rows compute junk, sliced off
    a_pk = a_in.reshape(m_pad, L)                    # free: row-major contiguous view

    # Explicit VMEM budget: double-buffered in/out tiles + resident weights + headroom,
    # capped below v7x's 64 MiB per-TC VMEM.
    tile_bytes = tm * L * itemsize
    weight_bytes = 2 * L * L * itemsize + 2 * L * itemsize
    vmem_limit = int(min(max(4 * tile_bytes + 4 * weight_bytes + (4 << 20), 8 << 20),
                         48 << 20))

    cost = pl.CostEstimate(
        flops=4 * m_pad * L * L,                     # two (L x L) MXU matmuls per packed row
        transcendentals=0,
        bytes_accessed=2 * n_pad * C * itemsize + weight_bytes,
    )

    out_pk = pl.pallas_call(
        angle_resnet_block_kernel,
        out_shape=jax.ShapeDtypeStruct((m_pad, L), dtype),
        grid_spec=pltpu.PrefetchScalarGridSpec(
            num_scalar_prefetch=0,
            grid=(grid_m,),
            in_specs=[
                pl.BlockSpec((tm, L), lambda i: (i, 0)),   # activation tile (lane-dense)
                pl.BlockSpec((L, L), lambda i: (0, 0)),    # W1_blk.T (resident)
                pl.BlockSpec((1, L), lambda i: (0, 0)),    # b1 row (lane-dense)
                pl.BlockSpec((L, L), lambda i: (0, 0)),    # W2_blk.T (resident)
                pl.BlockSpec((1, L), lambda i: (0, 0)),    # b2 row
            ],
            out_specs=pl.BlockSpec((tm, L), lambda i: (i, 0)),
        ),
        compiler_params=pltpu.CompilerParams(
            dimension_semantics=("parallel",),
            vmem_limit_bytes=vmem_limit,
        ),
        cost_estimate=cost,
    )(a_pk, w1t_blk, b1_blk, w2t_blk, b2_blk)

    out = out_pk.reshape(n_pad, C)                   # free reshape back
    if n_pad != N:
        out = out[:N]
    return out
    # TODO(synk): for bandwidth-limited deployments, accept/produce bf16 activations at
    # this boundary (keep f32 MXU accumulate + f32 residual add inside the kernel).


def reference(a, w1, b1, w2, b2):
    # Mirrors PyTorch: Linear(x) = x @ W.T + b with W in (C_out, C_in) layout.
    h = jnp.maximum(a, 0.0)
    h = h @ w1.T + b1
    h = jnp.maximum(h, 0.0)
    h = h @ w2.T + b2
    return h + a


if __name__ == "__main__":
    # Small shapes consistent with the module: batch=2, seq=8, c_hidden=32.
    batch, seq, c_hidden = 2, 8, 32
    key = jax.random.PRNGKey(0)
    k_a, k_w1, k_b1, k_w2, k_b2 = jax.random.split(key, 5)

    a3 = jax.random.normal(k_a, (batch, seq, c_hidden), dtype=jnp.float32)

    # Deterministic parameter init (PyTorch-Linear-like uniform bound 1/sqrt(C)),
    # stored in native PyTorch (C_out, C_in) layout.
    bound = 1.0 / (c_hidden ** 0.5)
    w1 = jax.random.uniform(k_w1, (c_hidden, c_hidden), jnp.float32, -bound, bound)
    b1 = jax.random.uniform(k_b1, (c_hidden,), jnp.float32, -bound, bound)
    w2 = jax.random.uniform(k_w2, (c_hidden, c_hidden), jnp.float32, -bound, bound)
    b2 = jax.random.uniform(k_b2, (c_hidden,), jnp.float32, -bound, bound)

    # Flatten leading dims to rows for the kernel.
    a2 = a3.reshape(batch * seq, c_hidden)
    out2 = angle_resnet_block(a2, w1, b1, w2, b2)
    out = out2.reshape(batch, seq, c_hidden)
    jax.block_until_ready(out)

    ref = reference(a3, w1, b1, w2, b2)
    assert jnp.allclose(out, ref, atol=1e-5, rtol=1e-5), "mismatch vs reference"

    print("KERNEL_OK")
</pallas_src>

<mosaic_0001>
module attributes {stable_mosaic.version = 11 : i64} {
  func.func @angle_resnet_block_kernel(%arg0: i32, %arg1: memref<8x128xf32, #tpu.memory_space<vmem>>, %arg2: memref<128x128xf32, #tpu.memory_space<vmem>>, %arg3: memref<1x128xf32, #tpu.memory_space<vmem>>, %arg4: memref<128x128xf32, #tpu.memory_space<vmem>>, %arg5: memref<1x128xf32, #tpu.memory_space<vmem>>, %arg6: memref<8x128xf32, #tpu.memory_space<vmem>>) attributes {dimension_semantics = [#tpu.dimension_semantics<parallel>], iteration_bounds = array<i64: 1>, scalar_prefetch = 0 : i64, scratch_operands = 0 : i64, tpu.core_type = #tpu.core_type<tc>, window_params = [{transform_indices = @transform_0, window_bounds = array<i64: 8, 128>}, {pipeline_mode = #tpu.pipeline_mode<synchronous>, transform_indices = @transform_1, window_bounds = array<i64: 128, 128>}, {pipeline_mode = #tpu.pipeline_mode<synchronous>, transform_indices = @transform_2, window_bounds = array<i64: 1, 128>}, {pipeline_mode = #tpu.pipeline_mode<synchronous>, transform_indices = @transform_3, window_bounds = array<i64: 128, 128>}, {pipeline_mode = #tpu.pipeline_mode<synchronous>, transform_indices = @transform_4, window_bounds = array<i64: 1, 128>}, {transform_indices = @transform_5, window_bounds = array<i64: 8, 128>}]} {
    %c0 = arith.constant 0 : index
    %c0_0 = arith.constant 0 : index
    %0 = vector.load %arg1[%c0, %c0_0] : memref<8x128xf32, #tpu.memory_space<vmem>>, vector<8x128xf32>
    %cst = arith.constant 0.000000e+00 : f32
    %1 = vector.broadcast %cst : f32 to vector<8x128xf32>
    %2 = arith.maximumf %0, %1 : vector<8x128xf32>
    %c0_1 = arith.constant 0 : index
    %c0_2 = arith.constant 0 : index
    %3 = vector.load %arg2[%c0_1, %c0_2] : memref<128x128xf32, #tpu.memory_space<vmem>>, vector<128x128xf32>
    %cst_3 = arith.constant dense<0.000000e+00> : vector<8x128xf32>
    %4 = tpu.matmul %2, %3, %cst_3 {dimension_numbers = #tpu.dot_dimension_numbers<[1], [0], [0], [1], [0, 0, 1, 1], [], []>} : vector<8x128xf32>, vector<128x128xf32>, vector<8x128xf32> -> vector<8x128xf32>
    %c0_4 = arith.constant 0 : index
    %c0_5 = arith.constant 0 : index
    %5 = vector.load %arg3[%c0_4, %c0_5] : memref<1x128xf32, #tpu.memory_space<vmem>>, vector<1x128xf32>
    %6 = vector.broadcast %5 : vector<1x128xf32> to vector<8x128xf32>
    %7 = arith.addf %4, %6 : vector<8x128xf32>
    %cst_6 = arith.constant 0.000000e+00 : f32
    %8 = vector.broadcast %cst_6 : f32 to vector<8x128xf32>
    %9 = arith.maximumf %7, %8 : vector<8x128xf32>
    %c0_7 = arith.constant 0 : index
    %c0_8 = arith.constant 0 : index
    %10 = vector.load %arg4[%c0_7, %c0_8] : memref<128x128xf32, #tpu.memory_space<vmem>>, vector<128x128xf32>
    %cst_9 = arith.constant dense<0.000000e+00> : vector<8x128xf32>
    %11 = tpu.matmul %9, %10, %cst_9 {dimension_numbers = #tpu.dot_dimension_numbers<[1], [0], [0], [1], [0, 0, 1, 1], [], []>} : vector<8x128xf32>, vector<128x128xf32>, vector<8x128xf32> -> vector<8x128xf32>
    %c0_10 = arith.constant 0 : index
    %c0_11 = arith.constant 0 : index
    %12 = vector.load %arg5[%c0_10, %c0_11] : memref<1x128xf32, #tpu.memory_space<vmem>>, vector<1x128xf32>
    %13 = vector.broadcast %12 : vector<1x128xf32> to vector<8x128xf32>
    %14 = arith.addf %11, %13 : vector<8x128xf32>
    %15 = arith.addf %14, %0 : vector<8x128xf32>
    %c0_12 = arith.constant 0 : index
    %c0_13 = arith.constant 0 : index
    %16 = vector.load %arg6[%c0_12, %c0_13] : memref<8x128xf32, #tpu.memory_space<vmem>>, vector<8x128xf32>
    tpu.vector_store %arg6[%c0_12, %c0_13], %15 {strides = array<i32>} : memref<8x128xf32, #tpu.memory_space<vmem>>, vector<8x128xf32>,
    return
  }
  func.func @transform_0(%arg0: i32) -> (i32, i32) {
    %c0_i32 = arith.constant 0 : i32
    %c0_i32_0 = arith.constant 0 : i32
    return %arg0, %c0_i32 : i32, i32
  }
  func.func @transform_1(%arg0: i32) -> (i32, i32) {
    %c0_i32 = arith.constant 0 : i32
    %c0_i32_0 = arith.constant 0 : i32
    %c0_i32_1 = arith.constant 0 : i32
    return %c0_i32, %c0_i32_0 : i32, i32
  }
  func.func @transform_2(%arg0: i32) -> (i32, i32) {
    %c0_i32 = arith.constant 0 : i32
    %c0_i32_0 = arith.constant 0 : i32
    %c0_i32_1 = arith.constant 0 : i32
    return %c0_i32, %c0_i32_0 : i32, i32
  }
  func.func @transform_3(%arg0: i32) -> (i32, i32) {
    %c0_i32 = arith.constant 0 : i32
    %c0_i32_0 = arith.constant 0 : i32
    %c0_i32_1 = arith.constant 0 : i32
    return %c0_i32, %c0_i32_0 : i32, i32
  }
  func.func @transform_4(%arg0: i32) -> (i32, i32) {
    %c0_i32 = arith.constant 0 : i32
    %c0_i32_0 = arith.constant 0 : i32
    %c0_i32_1 = arith.constant 0 : i32
    return %c0_i32, %c0_i32_0 : i32, i32
  }
  func.func @transform_5(%arg0: i32) -> (i32, i32) {
    %c0_i32 = arith.constant 0 : i32
    %c0_i32_0 = arith.constant 0 : i32
    return %arg0, %c0_i32 : i32, i32
  }
}

</mosaic_0001>

<bundles_post_ra>
// kernel: tpu_custom_call.1
= control target key start
LH: loop header
LB: loop body
LE: loop exit
PB: predicated region body
PF: predicated region fallthrough
CT: control target
= control target key end

     0   :  { %10 = vsyncpa [#allocation3], 0  ;;  %s557_s0 = inlined_call_operand.hbm [shape: f32[8,128], index: 0, kind: input, shape index: {}]   ;;  %s558_s1 = inlined_call_operand.hbm [shape: f32[128,128], index: 1, kind: input, shape index: {}]   ;;  %s559_s2 = inlined_call_operand.vmem [shape: f32[1,128], index: 2, kind: input, shape index: {}]   ;;  %s560_s3 = inlined_call_operand.hbm [shape: f32[128,128], index: 3, kind: input, shape index: {}]   ;;  %s561_s4 = inlined_call_operand.vmem [shape: f32[1,128], index: 4, kind: input, shape index: {}]   ;;  %s562_s5 = inlined_call_operand.hbm [shape: f32[8,128], index: 5, kind: output, shape index: {}]  }
   0x1   :  { %11 = vsyncpa [#allocation6], 0 }
   0x2   :  { %12 = vsyncpa [#allocation4], 0  ;;  %s467_s18 = smov [#allocation5]  }
   0x3   :  { %s28_s19 = sshll.u32 %s467_s18, 4  ;;  %s29_s19 = int_to_ptr.vmem [resolvable:$true] %s28_s19 }
   0x4   :  { %s389_s20 = scalar_lea.vmem %s29_s19, 2048  ;;  %p394_p1 = scmp.lt.s32.totalorder %s29_s19, %s29_s19 }
   0x5   :  { %p390_p0 = scmp.ne.s32.totalorder %s29_s19, %s389_s20  ;;  %p395_p2 = scmp.lt.s32.totalorder %s389_s20, %s389_s20 }
   0x7   :  { %p396_p3 = por %p395_p2, %p394_p1 }
   0x9   :  { %p397_p4 = pnand %p396_p3, %p390_p0 }
   0xb   :  { %400 = shalt.err (!%p397_p4)
}
   0xc   :  { %s468_s21 = smov 128   ;;  %s469_s22 = smov 8  }
   0xd   :  { %34 = dma.hbm_to_vmem [thread:$0]  %s558_s1, 2048, %s29_s19, [#allocation6], %s468_s21, %s468_s21, %s469_s22  }
   0xe   :  { %s470_s25 = smov [#allocation2]   ;;  %s471_s27 = smov [#allocation7]  }
   0xf   :  { %s19_s26 = sshll.u32 %s470_s25, 4  ;;  %s42_s28 = sshll.u32 %s471_s27, 4  ;;  %s20_s26 = int_to_ptr.vmem [resolvable:$true] %s19_s26  ;;  %s43_s28 = int_to_ptr.vmem [resolvable:$true] %s42_s28 }
  0x10   :  { %s409_s29 = scalar_lea.vmem %s20_s26, 128  ;;  %p414_p6 = scmp.lt.s32.totalorder %s20_s26, %s20_s26 }
  0x11   :  { %p410_p5 = scmp.ne.s32.totalorder %s20_s26, %s409_s29  ;;  %p415_p7 = scmp.lt.s32.totalorder %s409_s29, %s409_s29 }
  0x13   :  { %p416_p8 = por %p415_p7, %p414_p6 }
  0x15   :  { %p417_p9 = pnand %p416_p8, %p410_p5 }
  0x17   :  { %420 = shalt.err (!%p417_p9)
}
  0x18   :  { %22 = dma.hbm_to_vmem [thread:$0]  %s557_s0, 128, %s20_s26, [#allocation3]  }
  0x19   :  { %s429_s7 = scalar_lea.vmem %s43_s28, 2048  ;;  %p434_p11 = scmp.lt.s32.totalorder %s43_s28, %s43_s28 }
  0x1a   :  { %p430_p10 = scmp.ne.s32.totalorder %s43_s28, %s429_s7  ;;  %p435_p12 = scmp.lt.s32.totalorder %s429_s7, %s429_s7 }
  0x1c   :  { %p436_p13 = por %p435_p12, %p434_p11 }
  0x1e   :  { %p437_p0 = pnand %p436_p13, %p430_p10 }
  0x20   :  { %440 = shalt.err (!%p437_p0)
}
  0x21   :  { %48 = dma.hbm_to_vmem [thread:$0]  %s560_s3, 2048, %s43_s28, [#allocation6], %s468_s21, %s468_s21, %s469_s22  }
  0x22   :  { %461 = dma.done.wait [#allocation3], 128  }
  0x23   :  { %462 = vsyncadd [#allocation3], 4294967168 }
  0x24   :  { %463 = dma.done.wait [#allocation6], 4096  }
  0x25   :  { %464 = vsyncadd [#allocation6], 4294963200  ;;  %v472_v0 = vmov 0.0   ;;  %vm473_vm0 = vmmov 0   ;;  %v77_v1 = vld [vmem:[#allocation5 + $0x78] sm:$0xff]  ;;  %v76_v2 = vld [vmem:[#allocation5 + $0x70] sm:$0xff] }
  0x26   :  { %303 = vmatprep.subr.mxu0 %v472_v0  ;;  %335 = vmatprep.mubr.msk.f32.mxu0 %vm473_vm0, %v472_v0  ;;  %v75_v3 = vld [vmem:[#allocation5 + $0x68] sm:$0xff]  ;;  %v74_v4 = vld [vmem:[#allocation5 + $0x60] sm:$0xff]  ;;  %v171_v5 = vld [vmem:[#allocation7 + $0x78] sm:$0xff]  ;;  %s474_s11 = smov [#allocation8]  }
  0x27   :  { %338 = vmatprep.subr.mxu1 %v472_v0  ;;  %370 = vmatprep.mubr.msk.f32.mxu1 %vm473_vm0, %v472_v0  ;;  %v73_v6 = vld [vmem:[#allocation5 + $0x58] sm:$0xff]  ;;  %v170_v7 = vld [vmem:[#allocation7 + $0x70] sm:$0xff]  ;;  %v169_v8 = vld [vmem:[#allocation7 + $0x68] sm:$0xff]  ;;  %s257_s12 = sshll.u32 %s474_s11, 4  ;;  %s258_s12 = int_to_ptr.vmem [resolvable:$true] %s257_s12 }
  0x28   :  { %304 = vmatpush3.msra.mxu0 %v77_v1  ;;  %339 = vmatpush3.msra.mxu1 %v171_v5  ;;  %v72_v9 = vld [vmem:[#allocation5 + $0x50] sm:$0xff]  ;;  %v168_v10 = vld [vmem:[#allocation7 + $0x60] sm:$0xff]  ;;  %v71_v11 = vld [vmem:[#allocation5 + $0x48] sm:$0xff]  ;;  %s441_s13 = scalar_lea.vmem %s258_s12, 128  ;;  %p446_p2 = scmp.lt.s32.totalorder %s258_s12, %s258_s12 }
  0x29   :  { %305 = vmatprep.subr.mxu0 %v472_v0  ;;  %340 = vmatprep.subr.mxu1 %v472_v0  ;;  %v167_v12 = vld [vmem:[#allocation7 + $0x58] sm:$0xff]  ;;  %v70_v13 = vld [vmem:[#allocation5 + $0x40] sm:$0xff]  ;;  %v166_v14 = vld [vmem:[#allocation7 + $0x50] sm:$0xff]  ;;  %p442_p1 = scmp.ne.s32.totalorder %s258_s12, %s441_s13  ;;  %p447_p3 = scmp.lt.s32.totalorder %s441_s13, %s441_s13 }
  0x2a   :  { %306 = vmatpush3.msra.mxu0 %v76_v2  ;;  %341 = vmatpush3.msra.mxu1 %v170_v7  ;;  %v69_v15 = vld [vmem:[#allocation5 + $0x38] sm:$0xff]  ;;  %v165_v16 = vld [vmem:[#allocation7 + $0x48] sm:$0xff]  ;;  %v68_v17 = vld [vmem:[#allocation5 + $0x30] sm:$0xff] }
  0x2b   :  { %307 = vmatprep.subr.mxu0 %v472_v0  ;;  %342 = vmatprep.subr.mxu1 %v472_v0  ;;  %v164_v18 = vld [vmem:[#allocation7 + $0x40] sm:$0xff]  ;;  %v67_v19 = vld [vmem:[#allocation5 + $0x28] sm:$0xff]  ;;  %v163_v20 = vld [vmem:[#allocation7 + $0x38] sm:$0xff]  ;;  %p448_p4 = por %p447_p3, %p446_p2 }
  0x2c   :  { %308 = vmatpush3.msra.mxu0 %v75_v3  ;;  %343 = vmatpush3.msra.mxu1 %v169_v8  ;;  %v66_v21 = vld [vmem:[#allocation5 + $0x20] sm:$0xff]  ;;  %v162_v22 = vld [vmem:[#allocation7 + $0x30] sm:$0xff]  ;;  %v65_v23 = vld [vmem:[#allocation5 + $0x18] sm:$0xff] }
  0x2d   :  { %309 = vmatprep.subr.mxu0 %v472_v0  ;;  %344 = vmatprep.subr.mxu1 %v472_v0  ;;  %v161_v24 = vld [vmem:[#allocation7 + $0x28] sm:$0xff]  ;;  %v64_v25 = vld [vmem:[#allocation5 + $0x10] sm:$0xff]  ;;  %v60_v26 = vld [vmem:[#allocation2] sm:$0xff]  ;;  %p449_p5 = pnand %p448_p4, %p442_p1 }
  0x2e   :  { %310 = vmatpush3.msra.mxu0 %v74_v4  ;;  %345 = vmatpush3.msra.mxu1 %v168_v10  ;;  %v160_v27 = vld [vmem:[#allocation7 + $0x20] sm:$0xff]  ;;  %v63_v28 = vld [vmem:[#allocation5 + $0x8] sm:$0xff]  ;;  %v159_v29 = vld [vmem:[#allocation7 + $0x18] sm:$0xff]  ;;  %v61_v31 = vmax.f32 %v60_v26, 0.0 }
  0x2f   :  { %311 = vmatprep.subr.mxu0 %v472_v0  ;;  %346 = vmatprep.subr.mxu1 %v472_v0  ;;  %v62_v30 = vld [vmem:[#allocation5] sm:$0xff]  ;;  %v158_v32 = vld [vmem:[#allocation7 + $0x10] sm:$0xff]  ;;  %v157_v33 = vld [vmem:[#allocation7 + $0x8] sm:$0xff] }
  0x30   :  { %312 = vmatpush3.msra.mxu0 %v73_v6  ;;  %347 = vmatpush3.msra.mxu1 %v167_v12  ;;  %v156_v34 = vld [vmem:[#allocation7] sm:$0xff]  ;;  %v267_v35 = vld [vmem:[%s559_s2] ss:$0 sm:$0xff] }
  0x31   :  { %313 = vmatprep.subr.mxu0 %v472_v0  ;;  %348 = vmatprep.subr.mxu1 %v472_v0  ;;  %v268_v40 = vld [vmem:[%s561_s4] ss:$0 sm:$0xff] }
  0x32   :  { %314 = vmatpush3.msra.mxu0 %v72_v9  ;;  %349 = vmatpush3.msra.mxu1 %v166_v14 }
  0x33   :  { %315 = vmatprep.subr.mxu0 %v472_v0  ;;  %350 = vmatprep.subr.mxu1 %v472_v0 }
  0x34   :  { %316 = vmatpush3.msra.mxu0 %v71_v11  ;;  %351 = vmatpush3.msra.mxu1 %v165_v16 }
  0x35   :  { %317 = vmatprep.subr.mxu0 %v472_v0  ;;  %352 = vmatprep.subr.mxu1 %v472_v0 }
  0x36   :  { %318 = vmatpush3.msra.mxu0 %v70_v13  ;;  %353 = vmatpush3.msra.mxu1 %v164_v18 }
  0x37   :  { %319 = vmatprep.subr.mxu0 %v472_v0  ;;  %354 = vmatprep.subr.mxu1 %v472_v0 }
  0x38   :  { %320 = vmatpush3.msra.mxu0 %v69_v15  ;;  %355 = vmatpush3.msra.mxu1 %v163_v20 }
  0x39   :  { %321 = vmatprep.subr.mxu0 %v472_v0  ;;  %356 = vmatprep.subr.mxu1 %v472_v0 }
  0x3a   :  { %322 = vmatpush3.msra.mxu0 %v68_v17  ;;  %357 = vmatpush3.msra.mxu1 %v162_v22 }
  0x3b   :  { %323 = vmatprep.subr.mxu0 %v472_v0  ;;  %358 = vmatprep.subr.mxu1 %v472_v0 }
  0x3c   :  { %324 = vmatpush3.msra.mxu0 %v67_v19  ;;  %359 = vmatpush3.msra.mxu1 %v161_v24 }
  0x3d   :  { %325 = vmatprep.subr.mxu0 %v472_v0  ;;  %360 = vmatprep.subr.mxu1 %v472_v0 }
  0x3e   :  { %326 = vmatpush3.msra.mxu0 %v66_v21  ;;  %361 = vmatpush3.msra.mxu1 %v160_v27 }
  0x3f   :  { %327 = vmatprep.subr.mxu0 %v472_v0  ;;  %362 = vmatprep.subr.mxu1 %v472_v0 }
  0x40   :  { %328 = vmatpush3.msra.mxu0 %v65_v23  ;;  %363 = vmatpush3.msra.mxu1 %v159_v29 }
  0x41   :  { %329 = vmatprep.subr.mxu0 %v472_v0  ;;  %364 = vmatprep.subr.mxu1 %v472_v0 }
  0x42   :  { %330 = vmatpush3.msra.mxu0 %v64_v25  ;;  %365 = vmatpush3.msra.mxu1 %v158_v32 }
  0x43   :  { %331 = vmatprep.subr.mxu0 %v472_v0  ;;  %366 = vmatprep.subr.mxu1 %v472_v0 }
  0x44   :  { %332 = vmatpush3.msra.mxu0 %v63_v28  ;;  %367 = vmatpush3.msra.mxu1 %v157_v33 }
  0x45   :  { %333 = vmatprep.subr.mxu0 %v472_v0  ;;  %368 = vmatprep.subr.mxu1 %v472_v0 }
  0x46   :  { %334 = vmatpush3.msra.mxu0 %v62_v30  ;;  %369 = vmatpush3.msra.mxu1 %v156_v34 }
  0x47   :  { %336 = vmatmul.mubr.f32.vlgmr.msra.gmra.mxu0 %v61_v31 }
 0x107   :  { %v151_v36 = vpop.f32.mrf.mxu0 }
 0x108   :  { %v152_v37 = vadd.f32 %v267_v35, %v151_v36 }
 0x109   :  { %v337_v38 = vpop.f32.mrf.mxu0 }
 0x10a   :  { %v155_v39 = vmax.f32 %v152_v37, 0.0 }
 0x10c   :  { %371 = vmatmul.mubr.f32.vlgmr.msra.gmra.mxu1 %v155_v39 }
 0x1cc   :  { %v245_v41 = vpop.f32.mrf.mxu1 }
 0x1cd   :  { %v246_v42 = vadd.f32 %v268_v40, %v245_v41 }
 0x1ce   :  { %v372_v43 = vpop.f32.mrf.mxu1 }
 0x1cf   :  { %v249_v44 = vadd.f32 %v246_v42, %v60_v26 }
 0x1d1   :  { %250 = vst [vmem:[#allocation8] sm:$0xff] %v249_v44 }
 0x1d2   :  { %452 = shalt.err (!%p449_p5)
}
 0x1d3   :  { %260 = dma.vmem_to_hbm [thread:$0]  %s258_s12, 128, %s562_s5, [#allocation4]  }
 0x1d4   :  { %465 = dma.done.wait [#allocation4], 128  }
 0x1d5   :  { %466 = vsyncadd [#allocation4], 4294967168 }
 0x1d6   :  { %264 = vsyncpa [#allocation3], 1 }
 0x1d7   :  { %265 = vsyncpa [#allocation6], 1 }
 0x1d8   :  { %266 = vsyncpa [#allocation4], 1 }

</bundles_post_ra>
